<compile_context>
chip_gen: v5e
topology: v5e:2x2
jax: 0.10.0
libtpu: 0.0.40
codegen_flags: <defaults>
</compile_context>

<pallas_src>
import functools

import jax
import jax.numpy as jnp
from jax.experimental import pallas as pl
from jax.experimental.pallas import tpu as pltpu


def _round_up(x, m):
    return (x + m - 1) // m * m


# ------------------------------- kernels -------------------------------------

def _linear_relu_kernel_inplace(x_ref, w_ref, b_ref, o_ref, *, compute_dtype):
    """f32-output variant: accumulate directly into the resident output tile."""
    k = pl.program_id(2)

    @pl.when(k == 0)
    def _():
        o_ref[...] = jnp.zeros_like(o_ref)

    o_ref[...] += jnp.dot(x_ref[...].astype(compute_dtype),
                          w_ref[...].astype(compute_dtype),
                          preferred_element_type=jnp.float32)

    @pl.when(k == pl.num_programs(2) - 1)
    def _():
        o_ref[...] = jnp.maximum(o_ref[...] + b_ref[...], 0.0)


def _linear_relu_kernel_scratch(x_ref, w_ref, b_ref, o_ref, acc_ref, *,
                                compute_dtype):
    """Generic variant for non-f32 output dtypes (f32 VMEM accumulator)."""
    k = pl.program_id(2)

    @pl.when(k == 0)
    def _():
        acc_ref[...] = jnp.zeros_like(acc_ref)

    acc_ref[...] += jnp.dot(x_ref[...].astype(compute_dtype),
                            w_ref[...].astype(compute_dtype),
                            preferred_element_type=jnp.float32)

    @pl.when(k == pl.num_programs(2) - 1)
    def _():
        o_ref[...] = jnp.maximum(acc_ref[...] + b_ref[...], 0.0).astype(o_ref.dtype)


# ---------------------------- parameter prep ---------------------------------

def prepare_linear_params(weight_nk, bias_n, *, tn=512, tk=1024,
                          compute_dtype=jnp.float32):
    """One-time prep: transpose to [K, N], pad K/N to the tile grid, cast weight.

    weight_nk: [out, in] (PyTorch nn.Linear layout).  Returns
    (w_kn_padded, bias_padded_2d, meta).  Done once; the forward path never
    transposes, pads or rewrites the weight in HBM again.
    """
    assert tn % 128 == 0 and tk % 128 == 0, "tn/tk must be multiples of 128"
    w = jnp.asarray(weight_nk, dtype=jnp.float32)
    b = jnp.asarray(bias_n, dtype=jnp.float32)
    N, K = w.shape

    tn_e = min(tn, _round_up(N, 128))      # lane-dense output tile
    tk_e = min(tk, _round_up(K, 128))      # reduction tile
    Np = _round_up(N, tn_e)
    Kp = _round_up(K, tk_e)

    w_kn = w.T
    if (Kp, Np) != (K, N):
        w_kn = jnp.pad(w_kn, ((0, Kp - K), (0, Np - N)))
    w_kn = w_kn.astype(compute_dtype)

    b2 = b.reshape(1, N)
    if Np != N:
        b2 = jnp.pad(b2, ((0, 0), (0, Np - N)))

    meta = dict(K=K, N=N, Kp=Kp, Np=Np, tn_e=tn_e, tk_e=tk_e,
                compute_dtype=compute_dtype)
    return w_kn, b2, meta


# ------------------------------- forward -------------------------------------

def linear_block_forward(x, w_kn, bias2d, meta, *, tm=512, out_dtype=jnp.float32):
    """y = relu(x @ W^T + b) where (w_kn, bias2d, meta) come from prepare_linear_params."""
    M, K = x.shape
    assert K == meta["K"], "x inner dim must match weight inner dim"
    Kp, Np = meta["Kp"], meta["Np"]
    N = meta["N"]
    tn_e, tk_e = meta["tn_e"], meta["tk_e"]
    compute_dtype = meta["compute_dtype"]
    assert w_kn.shape == (Kp, Np) and bias2d.shape == (1, Np)

    tm_e = min(tm, _round_up(M, 8))        # sublane-aligned row tile
    Mp = _round_up(M, tm_e)

    # only x (activations) may need per-call padding; params were padded once.
    xp = x if (Mp, Kp) == (M, K) else jnp.pad(x, ((0, Mp - M), (0, Kp - K)))

    grid = (Mp // tm_e, Np // tn_e, Kp // tk_e)

    out_is_f32 = jnp.dtype(out_dtype) == jnp.dtype(jnp.float32)
    x_isz = jnp.dtype(xp.dtype).itemsize
    w_isz = jnp.dtype(w_kn.dtype).itemsize
    o_isz = jnp.dtype(out_dtype).itemsize

    # double-buffered VMEM footprint -> explicit scoped limit (v7x-safe cap).
    footprint = 2 * (tm_e * tk_e * x_isz + tk_e * tn_e * w_isz
                     + tm_e * tn_e * o_isz + tn_e * 4)
    if not out_is_f32:
        footprint += tm_e * tn_e * 4
    assert footprint <= (48 << 20), (
        f"tile config needs {footprint >> 20} MiB VMEM; shrink tm/tn/tk "
        "(v7x has only 64 MiB physical VMEM per TensorCore)")
    vmem_limit = int(min(max(2 * footprint, 32 << 20), 56 << 20))

    if out_is_f32:
        kernel = functools.partial(_linear_relu_kernel_inplace,
                                   compute_dtype=compute_dtype)
        scratch_shapes = []
    else:
        kernel = functools.partial(_linear_relu_kernel_scratch,
                                   compute_dtype=compute_dtype)
        scratch_shapes = [pltpu.VMEM((tm_e, tn_e), jnp.float32)]

    out = pl.pallas_call(
        kernel,
        out_shape=jax.ShapeDtypeStruct((Mp, Np), out_dtype),
        grid_spec=pltpu.PrefetchScalarGridSpec(
            num_scalar_prefetch=0,
            grid=grid,
            in_specs=[
                pl.BlockSpec((tm_e, tk_e), lambda i, j, k: (i, k)),   # x tile
                pl.BlockSpec((tk_e, tn_e), lambda i, j, k: (k, j)),   # weight tile
                pl.BlockSpec((1, tn_e), lambda i, j, k: (0, j)),      # bias tile
            ],
            out_specs=pl.BlockSpec((tm_e, tn_e), lambda i, j, k: (i, j)),
            scratch_shapes=scratch_shapes,
        ),
        compiler_params=pltpu.CompilerParams(
            dimension_semantics=("parallel", "parallel", "arbitrary"),
            vmem_limit_bytes=vmem_limit,
        ),
        cost_estimate=pl.CostEstimate(
            flops=2 * M * N * K,
            transcendentals=0,
            # account for tiled re-streaming: x re-read per N tile, w per M tile.
            bytes_accessed=(x_isz * M * K * (Np // tn_e)
                            + w_isz * K * N * (Mp // tm_e)
                            + o_isz * M * N),
        ),
    )(xp, w_kn, bias2d)

    if (Mp, Np) != (M, N):
        out = out[:M, :N]
    return out


# ------------------------------ init helpers ---------------------------------

def init_linear_params(key, input_dim, output_dim):
    """Deterministic init mirroring nn.Linear defaults (uniform +/- 1/sqrt(in))."""
    kw, kb = jax.random.split(key)
    bound = 1.0 / jnp.sqrt(jnp.float32(input_dim))
    weight = jax.random.uniform(
        kw, (output_dim, input_dim), jnp.float32, -bound, bound)
    bias = jax.random.uniform(
        kb, (output_dim,), jnp.float32, -bound, bound)
    return weight, bias


if __name__ == "__main__":
    key = jax.random.PRNGKey(0)
    kx, kp = jax.random.split(key)

    # ---- LinearBlock(input_dim=32, output_dim=32), small batch, f32 path ----
    batch, input_dim, output_dim = 16, 32, 32
    x = jax.random.normal(kx, (batch, input_dim), jnp.float32)
    weight, bias = init_linear_params(kp, input_dim, output_dim)
    w_kn, b2, meta = prepare_linear_params(weight, bias)   # one-time prep

    y = jax.block_until_ready(linear_block_forward(x, w_kn, b2, meta))
    y_ref = jnp.maximum(
        jnp.dot(x, weight.T, precision=jax.lax.Precision.HIGHEST) + bias, 0.0)
    assert jnp.allclose(y, y_ref, atol=1e-5, rtol=1e-5), "f32 path mismatch"

    # ---- ragged batch, tiled K/N, bf16 operand path (v6e/v7x MXU-native) ----
    M2, K2, N2 = 200, 640, 384
    kx2, kp2 = jax.random.split(jax.random.PRNGKey(1))
    x2 = jax.random.normal(kx2, (M2, K2), jnp.float32)
    w2, bias2 = init_linear_params(kp2, K2, N2)
    w_kn2, b22, meta2 = prepare_linear_params(
        w2, bias2, tn=256, tk=512, compute_dtype=jnp.bfloat16)
    y2 = jax.block_until_ready(
        linear_block_forward(x2, w_kn2, b22, meta2, tm=128))
    y2_ref = jnp.maximum(
        jnp.dot(x2, w2.T, precision=jax.lax.Precision.HIGHEST) + bias2, 0.0)
    assert jnp.allclose(y2, y2_ref, atol=2e-2, rtol=2e-2), "bf16 path mismatch"

    print("KERNEL_OK")
</pallas_src>

<mosaic_0001>
module attributes {stable_mosaic.version = 11 : i64} {
  func.func @_linear_relu_kernel_inplace(%arg0: i32, %arg1: i32, %arg2: i32, %arg3: memref<16x128xf32, #tpu.memory_space<vmem>>, %arg4: memref<128x128xf32, #tpu.memory_space<vmem>>, %arg5: memref<1x128xf32, #tpu.memory_space<vmem>>, %arg6: memref<16x128xf32, #tpu.memory_space<vmem>>) attributes {dimension_semantics = [#tpu.dimension_semantics<parallel>, #tpu.dimension_semantics<parallel>, #tpu.dimension_semantics<arbitrary>], iteration_bounds = array<i64: 1, 1, 1>, scalar_prefetch = 0 : i64, scratch_operands = 0 : i64, tpu.core_type = #tpu.core_type<tc>, window_params = [{transform_indices = @transform_0, window_bounds = array<i64: 16, 128>}, {transform_indices = @transform_1, window_bounds = array<i64: 128, 128>}, {transform_indices = @transform_2, window_bounds = array<i64: 1, 128>}, {transform_indices = @transform_3, window_bounds = array<i64: 16, 128>}]} {
    %c0_i32 = arith.constant 0 : i32
    %0 = arith.cmpi eq, %arg2, %c0_i32 : i32
    %1 = arith.extui %0 : i1 to i32
    %c0_i32_0 = arith.constant 0 : i32
    %2 = arith.cmpi ne, %1, %c0_i32_0 : i32
    scf.if %2 {
      %cst_10 = arith.constant 0.000000e+00 : f32
      %12 = vector.broadcast %cst_10 : f32 to vector<16x128xf32>
      %c0_11 = arith.constant 0 : index
      %c0_12 = arith.constant 0 : index
      %13 = vector.load %arg6[%c0_11, %c0_12] : memref<16x128xf32, #tpu.memory_space<vmem>>, vector<16x128xf32>
      tpu.vector_store %arg6[%c0_11, %c0_12], %12 {strides = array<i32>} : memref<16x128xf32, #tpu.memory_space<vmem>>, vector<16x128xf32>,
    } else {
    }
    %c0 = arith.constant 0 : index
    %c0_1 = arith.constant 0 : index
    %3 = vector.load %arg6[%c0, %c0_1] : memref<16x128xf32, #tpu.memory_space<vmem>>, vector<16x128xf32>
    %c0_2 = arith.constant 0 : index
    %c0_3 = arith.constant 0 : index
    %4 = vector.load %arg3[%c0_2, %c0_3] : memref<16x128xf32, #tpu.memory_space<vmem>>, vector<16x128xf32>
    %c0_4 = arith.constant 0 : index
    %c0_5 = arith.constant 0 : index
    %5 = vector.load %arg4[%c0_4, %c0_5] : memref<128x128xf32, #tpu.memory_space<vmem>>, vector<128x128xf32>
    %cst = arith.constant dense<0.000000e+00> : vector<16x128xf32>
    %6 = tpu.matmul %4, %5, %cst {dimension_numbers = #tpu.dot_dimension_numbers<[1], [0], [0], [1], [0, 0, 1, 1], [], []>} : vector<16x128xf32>, vector<128x128xf32>, vector<16x128xf32> -> vector<16x128xf32>
    %7 = arith.addf %3, %6 : vector<16x128xf32>
    %c0_6 = arith.constant 0 : index
    %c0_7 = arith.constant 0 : index
    %8 = vector.load %arg6[%c0_6, %c0_7] : memref<16x128xf32, #tpu.memory_space<vmem>>, vector<16x128xf32>
    tpu.vector_store %arg6[%c0_6, %c0_7], %7 {strides = array<i32>} : memref<16x128xf32, #tpu.memory_space<vmem>>, vector<16x128xf32>,
    %c0_i32_8 = arith.constant 0 : i32
    %9 = arith.cmpi eq, %arg2, %c0_i32_8 : i32
    %10 = arith.extui %9 : i1 to i32
    %c0_i32_9 = arith.constant 0 : i32
    %11 = arith.cmpi ne, %10, %c0_i32_9 : i32
    scf.if %11 {
      %c0_10 = arith.constant 0 : index
      %c0_11 = arith.constant 0 : index
      %12 = vector.load %arg6[%c0_10, %c0_11] : memref<16x128xf32, #tpu.memory_space<vmem>>, vector<16x128xf32>
      %c0_12 = arith.constant 0 : index
      %c0_13 = arith.constant 0 : index
      %13 = vector.load %arg5[%c0_12, %c0_13] : memref<1x128xf32, #tpu.memory_space<vmem>>, vector<1x128xf32>
      %14 = vector.broadcast %13 : vector<1x128xf32> to vector<16x128xf32>
      %15 = arith.addf %12, %14 : vector<16x128xf32>
      %cst_14 = arith.constant 0.000000e+00 : f32
      %16 = vector.broadcast %cst_14 : f32 to vector<16x128xf32>
      %17 = arith.maximumf %15, %16 : vector<16x128xf32>
      %c0_15 = arith.constant 0 : index
      %c0_16 = arith.constant 0 : index
      %18 = vector.load %arg6[%c0_15, %c0_16] : memref<16x128xf32, #tpu.memory_space<vmem>>, vector<16x128xf32>
      tpu.vector_store %arg6[%c0_15, %c0_16], %17 {strides = array<i32>} : memref<16x128xf32, #tpu.memory_space<vmem>>, vector<16x128xf32>,
    } else {
    }
    return
  }
  func.func @transform_0(%arg0: i32, %arg1: i32, %arg2: i32) -> (i32, i32) {
    %c0_i32 = arith.constant 0 : i32
    return %arg0, %arg2 : i32, i32
  }
  func.func @transform_1(%arg0: i32, %arg1: i32, %arg2: i32) -> (i32, i32) {
    %c0_i32 = arith.constant 0 : i32
    return %arg2, %arg1 : i32, i32
  }
  func.func @transform_2(%arg0: i32, %arg1: i32, %arg2: i32) -> (i32, i32) {
    %c0_i32 = arith.constant 0 : i32
    %c0_i32_0 = arith.constant 0 : i32
    return %c0_i32, %arg1 : i32, i32
  }
  func.func @transform_3(%arg0: i32, %arg1: i32, %arg2: i32) -> (i32, i32) {
    %c0_i32 = arith.constant 0 : i32
    return %arg0, %arg1 : i32, i32
  }
}

</mosaic_0001>

<bundles_post_ra>
// kernel: tpu_custom_call.1
= control target key start
LH: loop header
LB: loop body
LE: loop exit
PB: predicated region body
PF: predicated region fallthrough
CT: control target
= control target key end

     0   :  { %8 = vsyncpa [#allocation3], 0  ;;  %s282_s0 = inlined_call_operand.hbm [shape: f32[16,128], index: 0, kind: input, shape index: {}]   ;;  %s283_s1 = inlined_call_operand.hbm [shape: f32[128,128], index: 1, kind: input, shape index: {}]   ;;  %s284_s2 = inlined_call_operand.vmem [shape: f32[1,128], index: 2, kind: input, shape index: {}]   ;;  %s285_s3 = inlined_call_operand.hbm [shape: f32[16,128], index: 3, kind: output, shape index: {}]  }
   0x1   :  { %9 = vsyncpa [#allocation6], 0 }
   0x2   :  { %10 = vsyncpa [#allocation4], 0  ;;  %s15_s14 = sshll.u32 %s282_s0, 4  ;;  %s236_s15 = smov [#allocation2]   ;;  %s16_s14 = int_to_ptr.hbm [resolvable:$true] %s15_s14 }
   0x3   :  { %s17_s16 = sshll.u32 %s236_s15, 4  ;;  %s28_s19 = sshll.u32 %s283_s1, 4  ;;  %s18_s16 = int_to_ptr.vmem [resolvable:$true] %s17_s16  ;;  %s29_s19 = int_to_ptr.hbm [resolvable:$true] %s28_s19 }
   0x4   :  { %s237_s20 = smov 128   ;;  %s238_s21 = smov 8  }
   0x5   :  { %23 = dma.hbm_to_vmem [thread:$0]  %s16_s14, 256, %s18_s16, [#allocation3], %s237_s20, %s237_s20, %s238_s21  }
   0x6   :  { %s239_s22 = smov [#allocation5]  }
   0x7   :  { %s30_s23 = sshll.u32 %s239_s22, 4  ;;  %s31_s23 = int_to_ptr.vmem [resolvable:$true] %s30_s23 }
   0x8   :  { %36 = dma.hbm_to_vmem [thread:$0]  %s29_s19, 2048, %s31_s23, [#allocation6], %s237_s20, %s237_s20, %s238_s21  }
   0x9   :  { %230 = dma.done.wait [#allocation3], 256  }
   0xa   :  { %231 = vsyncadd [#allocation3], 4294967040 }
   0xb   :  { %232 = dma.done.wait [#allocation6], 2048  }
   0xc   :  { %233 = vsyncadd [#allocation6], 4294965248  ;;  %v72_v0 = vld [vmem:[#allocation5 + $0x78] sm:$0xff]  ;;  %v71_v1 = vld [vmem:[#allocation5 + $0x70] sm:$0xff]  ;;  %s240_s24 = smov [#allocation7]   ;;  %s121_s28 = sshll.u32 %s285_s3, 4  ;;  %s122_s28 = int_to_ptr.hbm [resolvable:$true] %s121_s28 }
   0xd   :  { %73 = vmatpush.msra.mxu0 %v72_v0  ;;  %135 = vmatpush.msra.mxu1 %v72_v0  ;;  %v70_v2 = vld [vmem:[#allocation5 + $0x68] sm:$0xff]  ;;  %v69_v3 = vld [vmem:[#allocation5 + $0x60] sm:$0xff]  ;;  %v68_v4 = vld [vmem:[#allocation5 + $0x58] sm:$0xff]  ;;  %s119_s25 = sshll.u32 %s240_s24, 4  ;;  %s120_s25 = int_to_ptr.vmem [resolvable:$true] %s119_s25 }
   0xe   :  { %v67_v5 = vld [vmem:[#allocation5 + $0x50] sm:$0xff]  ;;  %v66_v6 = vld [vmem:[#allocation5 + $0x48] sm:$0xff]  ;;  %v65_v7 = vld [vmem:[#allocation5 + $0x40] sm:$0xff] }
   0xf   :  { %74 = vmatpush.msra.mxu0 %v71_v1  ;;  %136 = vmatpush.msra.mxu1 %v71_v1  ;;  %v64_v8 = vld [vmem:[#allocation5 + $0x38] sm:$0xff]  ;;  %v63_v9 = vld [vmem:[#allocation5 + $0x30] sm:$0xff]  ;;  %v62_v10 = vld [vmem:[#allocation5 + $0x28] sm:$0xff] }
  0x10   :  { %v61_v11 = vld [vmem:[#allocation5 + $0x20] sm:$0xff]  ;;  %v60_v12 = vld [vmem:[#allocation5 + $0x18] sm:$0xff]  ;;  %v59_v13 = vld [vmem:[#allocation5 + $0x10] sm:$0xff] }
  0x11   :  { %75 = vmatpush.msra.mxu0 %v70_v2  ;;  %137 = vmatpush.msra.mxu1 %v70_v2  ;;  %v58_v14 = vld [vmem:[#allocation5 + $0x8] sm:$0xff]  ;;  %v57_v15 = vld [vmem:[#allocation5] sm:$0xff]  ;;  %v55_v16 = vld [vmem:[#allocation2] sm:$0xff] }
  0x12   :  { %v56_v17 = vld [vmem:[#allocation2 + $0x8] sm:$0xff]  ;;  %v157_v18 = vld [vmem:[%s284_s2] ss:$0 sm:$0xff] }
  0x13   :  { %76 = vmatpush.msra.mxu0 %v69_v3  ;;  %138 = vmatpush.msra.mxu1 %v69_v3 }
  0x15   :  { %77 = vmatpush.msra.mxu0 %v68_v4  ;;  %139 = vmatpush.msra.mxu1 %v68_v4 }
  0x17   :  { %78 = vmatpush.msra.mxu0 %v67_v5  ;;  %140 = vmatpush.msra.mxu1 %v67_v5 }
  0x19   :  { %79 = vmatpush.msra.mxu0 %v66_v6  ;;  %141 = vmatpush.msra.mxu1 %v66_v6 }
  0x1b   :  { %80 = vmatpush.msra.mxu0 %v65_v7  ;;  %142 = vmatpush.msra.mxu1 %v65_v7 }
  0x1d   :  { %81 = vmatpush.msra.mxu0 %v64_v8  ;;  %143 = vmatpush.msra.mxu1 %v64_v8 }
  0x1f   :  { %82 = vmatpush.msra.mxu0 %v63_v9  ;;  %144 = vmatpush.msra.mxu1 %v63_v9 }
  0x21   :  { %83 = vmatpush.msra.mxu0 %v62_v10  ;;  %145 = vmatpush.msra.mxu1 %v62_v10 }
  0x23   :  { %84 = vmatpush.msra.mxu0 %v61_v11  ;;  %146 = vmatpush.msra.mxu1 %v61_v11 }
  0x25   :  { %85 = vmatpush.msra.mxu0 %v60_v12  ;;  %147 = vmatpush.msra.mxu1 %v60_v12 }
  0x27   :  { %86 = vmatpush.msra.mxu0 %v59_v13  ;;  %148 = vmatpush.msra.mxu1 %v59_v13 }
  0x29   :  { %87 = vmatpush.msra.mxu0 %v58_v14  ;;  %149 = vmatpush.msra.mxu1 %v58_v14 }
  0x2b   :  { %88 = vmatpush.msra.mxu0 %v57_v15  ;;  %150 = vmatpush.msra.mxu1 %v57_v15 }
  0x2c   :  { %89 = vmatmul.f32.vlgmr.msra.gmra.mxu0 %v55_v16  ;;  %92 = vmatmul.f32.vlgmr.msra.gmra.mxu1 %v56_v17 }
  0xa9   :  { %v90_v19 = vpop.f32.mrf.mxu0  ;;  %v93_v20 = vpop.f32.mrf.mxu1 }
  0xaa   :  { %v109_v21 = vadd.f32 %v157_v18, %v90_v19  ;;  %v110_v22 = vadd.f32 %v157_v18, %v93_v20 }
  0xac   :  { %v111_v23 = vmax.f32 %v109_v21, 0.0  ;;  %v112_v24 = vmax.f32 %v110_v22, 0.0 }
  0xae   :  { %113 = vst [vmem:[#allocation7] sm:$0xff] %v111_v23 }
  0xaf   :  { %114 = vst [vmem:[#allocation7 + $0x8] sm:$0xff] %v112_v24 }
  0xb0   :  { %127 = dma.vmem_to_hbm [thread:$0]  %s120_s25, 256, %s122_s28, [#allocation4], %s237_s20, %s237_s20, %s238_s21  }
  0xb1   :  { %234 = dma.done.wait [#allocation4], 256  }
  0xb2   :  { %235 = vsyncadd [#allocation4], 4294967040 }
  0xb3   :  { %132 = vsyncpa [#allocation3], 1 }
  0xb4   :  { %133 = vsyncpa [#allocation6], 1 }
  0xb5   :  { %134 = vsyncpa [#allocation4], 1 }

</bundles_post_ra>
